<compile_context>
chip_gen: v5e
topology: v5e:2x2
jax: 0.10.0
libtpu: 0.0.40
codegen_flags: <defaults>
</compile_context>

<pallas_src>
import jax
import jax.numpy as jnp
from jax.experimental import pallas as pl
from jax.experimental.pallas import tpu as pltpu


def _round_up(x, m):
    return (x + m - 1) // m * m


def _vmem_plan_budget():
    """(planning budget, scoped vmem limit) derived from the actual chip's VMEM capacity."""
    try:
        cap = int(pltpu.get_tpu_info().vmem_capacity_bytes)
    except Exception:
        cap = 64 << 20  # conservative fallback (v7x per-core VMEM)
    limit = min(cap * 3 // 4, 100 << 20)   # ~48 MiB on v7x, ~96 MiB on v5e/v6e
    return limit - (4 << 20), limit        # leave headroom for compiler-internal scratch


def _plan_tiles(B, K, H1, NC_pad, x_bytes, w_bytes, budget):
    """Pick (TB, TK, B_pad, nk) so the double-buffered working set fits `budget` bytes."""
    h1_lanes = _round_up(H1, 128)  # VMEM lane padding of the hidden dim

    # Resident objects (double-buffered by default): fc1/fc2 biases + fc2 weight.
    fixed = 2 * (8 * h1_lanes * 4 + 8 * NC_pad * 4)
    fixed += 2 * _round_up(H1, 8) * NC_pad * 4

    # --- K (reduction) tile: keep the folded fc1 weight chunk within ~1/3 of the budget.
    w_full = 2 * _round_up(K, 8) * h1_lanes * w_bytes
    if w_full <= budget // 3:
        TK, nk = K, 1
    else:
        # Stream the expanded weight in 128-aligned K chunks.
        assert K % 128 == 0, (
            "K-chunked path needs C*H*W % 128 == 0"
            "  # TODO(synk): add automatic K padding for huge, unaligned C*H*W")
        cap_rows = max(128, (budget // 3) // (2 * h1_lanes * w_bytes))
        cap_units = max(1, cap_rows // 128)
        units = K // 128
        d = 1
        for cand in range(min(cap_units, units), 0, -1):
            if units % cand == 0:
                d = cand
                break
        TK = d * 128
        nk = K // TK

    # --- batch tile: ~2 MiB per input DMA buffer, must fit the remaining VMEM, and keep
    # at least 2 batch grid steps when B allows it (so "parallel" shards both v7x cores).
    w_chunk = 2 * _round_up(TK, 8) * h1_lanes * w_bytes
    per_row = (2 * _round_up(TK, 128) * x_bytes   # double-buffered x tile row
               + 2 * NC_pad * 4                   # double-buffered output tile row
               + h1_lanes * 4)                    # accumulator row
    avail = budget - fixed - w_chunk
    tb_vmem = max(8, avail // per_row)
    tb_target = max(8, (2 << 20) // max(1, TK * x_bytes))
    TB = max(8, min(tb_vmem, tb_target, 1024) // 8 * 8)
    if B > 8:
        TB = min(TB, _round_up((B + 1) // 2, 8))  # >= 2 batch steps

    if B <= TB:
        return B, TK, B, nk                       # single full-batch block (always legal)

    # Prefer a multiple-of-8 divisor of B (no activation pad copy); else pad B up to TB.
    for cand in range(TB, 7, -8):
        if B % cand == 0:
            return cand, TK, B, nk
    return TB, TK, _round_up(B, TB), nk


def prepare_classifier_params(w1, b1, w2, b2, H, W, stream_dtype=jnp.float32):
    """One-time parameter prep (hoisted out of the per-forward path).

    Folds AdaptiveAvgPool2d((1,1)) into fc1: row c*HW + hw of the expanded weight is
    w1[c]/HW.  Only the class dim is zero-padded to 128 lanes (unmasked output stores);
    the hidden dim stays unpadded.
    """
    HW = H * W
    C, H1 = w1.shape
    NC = w2.shape[1]
    NC_pad = _round_up(NC, 128)
    w1e = (jnp.repeat(w1.astype(jnp.float32), HW, axis=0)
           / jnp.float32(HW)).astype(stream_dtype)                    # (C*HW, H1)
    b1p = b1.astype(jnp.float32).reshape(1, H1)
    w2p = jnp.pad(w2.astype(jnp.float32), ((0, 0), (0, NC_pad - NC)))  # (H1, NC_pad)
    b2p = jnp.pad(b2.astype(jnp.float32), (0, NC_pad - NC)).reshape(1, NC_pad)
    return w1e, b1p, w2p, b2p


def classifier_kernel(x_ref, w1_ref, b1_ref, w2_ref, b2_ref, o_ref, acc_ref):
    # x_ref : (TB, TK)       flattened activations (lane-dense, native dtype)
    # w1_ref: (TK, H1)       fc1 weight chunk, pre-expanded over HW and pre-scaled by 1/HW
    # b1_ref: (1, H1)        f32
    # w2_ref: (H1, NC_pad)   f32
    # b2_ref: (1, NC_pad)    f32
    # o_ref : (TB, NC_pad)   f32 logits (class-dim padded)
    # acc_ref: (TB, H1)      f32 fc1 pre-activation accumulator (persists across K steps)
    k = pl.program_id(1)

    @pl.when(k == 0)
    def _init():
        acc_ref[...] = jnp.zeros_like(acc_ref)

    # AvgPool(1,1) + fc1 fused into a single MXU matmul, accumulated in f32 over K chunks.
    acc_ref[...] += jnp.dot(x_ref[...], w1_ref[...], preferred_element_type=jnp.float32)

    @pl.when(k == pl.num_programs(1) - 1)
    def _finalize():
        h = jnp.maximum(acc_ref[...] + b1_ref[...], 0.0)                 # bias + ReLU
        out = jnp.dot(h, w2_ref[...], preferred_element_type=jnp.float32) + b2_ref[...]
        o_ref[...] = out.astype(o_ref.dtype)


def classifier_forward(x_nchw, w1e, b1p, w2p, b2p, num_classes, vmem_budget_bytes=None):
    """x_nchw: (B, C, H, W); params from prepare_classifier_params.  Returns f32 (B, NC)."""
    B, C, H, W = x_nchw.shape
    K = C * H * W
    H1 = w1e.shape[1]
    NC_pad = w2p.shape[1]
    assert w1e.shape[0] == K, "expanded fc1 weight must match C*H*W"

    x_flat = x_nchw.reshape(B, K)            # row-major flatten: free, no K-pad copy

    plan_budget, vmem_limit = _vmem_plan_budget()
    if vmem_budget_bytes is not None:        # override for testing / tuning
        plan_budget = vmem_budget_bytes
    TB, TK, B_pad, nk = _plan_tiles(
        B, K, H1, NC_pad, x_flat.dtype.itemsize, w1e.dtype.itemsize, plan_budget)

    if B_pad != B:                           # only when no multiple-of-8 divisor of B fits
        x_flat = jnp.pad(x_flat, ((0, B_pad - B), (0, 0)))

    grid = (B_pad // TB, nk)                 # batch parallel, K reduction last
    out_pad = pl.pallas_call(
        classifier_kernel,
        out_shape=jax.ShapeDtypeStruct((B_pad, NC_pad), jnp.float32),
        grid=grid,
        in_specs=[
            pl.BlockSpec((TB, TK), lambda i, k: (i, k)),       # activations: streamed
            pl.BlockSpec((TK, H1), lambda i, k: (k, 0)),       # folded fc1 weight chunk
            pl.BlockSpec((1, H1), lambda i, k: (0, 0)),        # fc1 bias (resident, tiny)
            pl.BlockSpec((H1, NC_pad), lambda i, k: (0, 0)),   # fc2 weight (resident, tiny)
            pl.BlockSpec((1, NC_pad), lambda i, k: (0, 0)),    # fc2 bias (resident, tiny)
        ],
        out_specs=pl.BlockSpec((TB, NC_pad), lambda i, k: (i, 0)),
        scratch_shapes=[pltpu.VMEM((TB, H1), jnp.float32)],    # fc1 pre-activation acc
        compiler_params=pltpu.CompilerParams(
            dimension_semantics=("parallel", "arbitrary"),
            vmem_limit_bytes=vmem_limit,
        ),
    )(x_flat, w1e, b1p, w2p, b2p)

    return out_pad[:B, :num_classes]


if __name__ == "__main__":
    keys = jax.random.split(jax.random.PRNGKey(0), 10)

    def make_params(k4, C, NC):
        H1 = C // 4
        s1 = 1.0 / jnp.sqrt(jnp.float32(C))
        s2 = 1.0 / jnp.sqrt(jnp.float32(H1))
        w1 = jax.random.uniform(k4[0], (C, H1), jnp.float32, -1.0, 1.0) * s1
        b1 = jax.random.uniform(k4[1], (H1,), jnp.float32, -1.0, 1.0) * s1
        w2 = jax.random.uniform(k4[2], (H1, NC), jnp.float32, -1.0, 1.0) * s2
        b2 = jax.random.uniform(k4[3], (NC,), jnp.float32, -1.0, 1.0) * s2
        return w1, b1, w2, b2

    def reference(x, w1, b1, w2, b2):
        pooled = jnp.mean(x.astype(jnp.float32).reshape(x.shape[0], x.shape[1], -1), axis=-1)
        return jnp.maximum(pooled @ w1 + b1, 0.0) @ w2 + b2

    # ---- Test 1: module-sized shapes (num_features=32, num_classes=10), f32 streaming.
    B, C, H, W, NC = 2, 32, 8, 8, 10
    x = jax.random.normal(keys[0], (B, C, H, W), jnp.float32)
    w1, b1, w2, b2 = make_params(keys[1:5], C, NC)
    params = prepare_classifier_params(w1, b1, w2, b2, H, W)   # one-time weight prep
    out = classifier_forward(x, *params, num_classes=NC)
    jax.block_until_ready(out)
    assert out.shape == (B, NC)
    assert jnp.allclose(out, reference(x, w1, b1, w2, b2), atol=2e-5, rtol=2e-5)

    # ---- Test 2: exercises the K-chunked accumulator path + multi-step parallel batch grid
    # (a tiny planning budget stands in for a huge C*H*W on a 64 MiB-VMEM v7x core).
    B2, C2, H2, W2, NC2 = 48, 256, 8, 8, 10
    x2 = jax.random.normal(keys[5], (B2, C2, H2, W2), jnp.float32)
    w1_2, b1_2, w2_2, b2_2 = make_params(keys[6:10], C2, NC2)
    params2 = prepare_classifier_params(w1_2, b1_2, w2_2, b2_2, H2, W2)
    out2 = classifier_forward(x2, *params2, num_classes=NC2, vmem_budget_bytes=6 << 20)
    assert jnp.allclose(out2, reference(x2, w1_2, b1_2, w2_2, b2_2), atol=5e-4, rtol=5e-4)

    # ---- Test 3: bf16 streaming of activations + folded fc1 weight (f32 accumulation).
    params_bf16 = prepare_classifier_params(w1, b1, w2, b2, H, W, stream_dtype=jnp.bfloat16)
    out3 = classifier_forward(x.astype(jnp.bfloat16), *params_bf16, num_classes=NC)
    assert jnp.allclose(out3, reference(x, w1, b1, w2, b2), atol=3e-2, rtol=3e-2)

    print("KERNEL_OK")
</pallas_src>

<mosaic_0001>
module attributes {stable_mosaic.version = 11 : i64} {
  func.func @classifier_kernel(%arg0: i32, %arg1: i32, %arg2: memref<2x2048xf32, #tpu.memory_space<vmem>>, %arg3: memref<2048x8xf32, #tpu.memory_space<vmem>>, %arg4: memref<1x8xf32, #tpu.memory_space<vmem>>, %arg5: memref<8x128xf32, #tpu.memory_space<vmem>>, %arg6: memref<1x128xf32, #tpu.memory_space<vmem>>, %arg7: memref<2x128xf32, #tpu.memory_space<vmem>>, %arg8: memref<2x8xf32, #tpu.memory_space<vmem>>) attributes {dimension_semantics = [#tpu.dimension_semantics<parallel>, #tpu.dimension_semantics<arbitrary>], iteration_bounds = array<i64: 1, 1>, scalar_prefetch = 0 : i64, scratch_operands = 1 : i64, tpu.core_type = #tpu.core_type<tc>, window_params = [{transform_indices = @transform_0, window_bounds = array<i64: 2, 2048>}, {transform_indices = @transform_1, window_bounds = array<i64: 2048, 8>}, {pipeline_mode = #tpu.pipeline_mode<synchronous>, transform_indices = @transform_2, window_bounds = array<i64: 1, 8>}, {pipeline_mode = #tpu.pipeline_mode<synchronous>, transform_indices = @transform_3, window_bounds = array<i64: 8, 128>}, {pipeline_mode = #tpu.pipeline_mode<synchronous>, transform_indices = @transform_4, window_bounds = array<i64: 1, 128>}, {transform_indices = @transform_5, window_bounds = array<i64: 2, 128>}]} {
    %c0_i32 = arith.constant 0 : i32
    %0 = arith.cmpi eq, %arg1, %c0_i32 : i32
    %1 = arith.extui %0 : i1 to i32
    %c0_i32_0 = arith.constant 0 : i32
    %2 = arith.cmpi ne, %1, %c0_i32_0 : i32
    scf.if %2 {
      %cst_10 = arith.constant 0.000000e+00 : f32
      %12 = vector.broadcast %cst_10 : f32 to vector<2x8xf32>
      %c0_11 = arith.constant 0 : index
      %c0_12 = arith.constant 0 : index
      %13 = vector.load %arg8[%c0_11, %c0_12] : memref<2x8xf32, #tpu.memory_space<vmem>>, vector<2x8xf32>
      tpu.vector_store %arg8[%c0_11, %c0_12], %12 {strides = array<i32>} : memref<2x8xf32, #tpu.memory_space<vmem>>, vector<2x8xf32>,
    } else {
    }
    %c0 = arith.constant 0 : index
    %c0_1 = arith.constant 0 : index
    %3 = vector.load %arg8[%c0, %c0_1] : memref<2x8xf32, #tpu.memory_space<vmem>>, vector<2x8xf32>
    %c0_2 = arith.constant 0 : index
    %c0_3 = arith.constant 0 : index
    %4 = vector.load %arg2[%c0_2, %c0_3] : memref<2x2048xf32, #tpu.memory_space<vmem>>, vector<2x2048xf32>
    %c0_4 = arith.constant 0 : index
    %c0_5 = arith.constant 0 : index
    %5 = vector.load %arg3[%c0_4, %c0_5] : memref<2048x8xf32, #tpu.memory_space<vmem>>, vector<2048x8xf32>
    %cst = arith.constant dense<0.000000e+00> : vector<2x8xf32>
    %6 = tpu.matmul %4, %5, %cst {dimension_numbers = #tpu.dot_dimension_numbers<[1], [0], [0], [1], [0, 0, 1, 1], [], []>} : vector<2x2048xf32>, vector<2048x8xf32>, vector<2x8xf32> -> vector<2x8xf32>
    %7 = arith.addf %3, %6 : vector<2x8xf32>
    %c0_6 = arith.constant 0 : index
    %c0_7 = arith.constant 0 : index
    %8 = vector.load %arg8[%c0_6, %c0_7] : memref<2x8xf32, #tpu.memory_space<vmem>>, vector<2x8xf32>
    tpu.vector_store %arg8[%c0_6, %c0_7], %7 {strides = array<i32>} : memref<2x8xf32, #tpu.memory_space<vmem>>, vector<2x8xf32>,
    %c0_i32_8 = arith.constant 0 : i32
    %9 = arith.cmpi eq, %arg1, %c0_i32_8 : i32
    %10 = arith.extui %9 : i1 to i32
    %c0_i32_9 = arith.constant 0 : i32
    %11 = arith.cmpi ne, %10, %c0_i32_9 : i32
    scf.if %11 {
      %c0_10 = arith.constant 0 : index
      %c0_11 = arith.constant 0 : index
      %12 = vector.load %arg8[%c0_10, %c0_11] : memref<2x8xf32, #tpu.memory_space<vmem>>, vector<2x8xf32>
      %c0_12 = arith.constant 0 : index
      %c0_13 = arith.constant 0 : index
      %13 = vector.load %arg4[%c0_12, %c0_13] : memref<1x8xf32, #tpu.memory_space<vmem>>, vector<1x8xf32>
      %14 = vector.broadcast %13 : vector<1x8xf32> to vector<2x8xf32>
      %15 = arith.addf %12, %14 : vector<2x8xf32>
      %cst_14 = arith.constant 0.000000e+00 : f32
      %16 = vector.broadcast %cst_14 : f32 to vector<2x8xf32>
      %17 = arith.maximumf %15, %16 : vector<2x8xf32>
      %c0_15 = arith.constant 0 : index
      %c0_16 = arith.constant 0 : index
      %18 = vector.load %arg5[%c0_15, %c0_16] : memref<8x128xf32, #tpu.memory_space<vmem>>, vector<8x128xf32>
      %cst_17 = arith.constant dense<0.000000e+00> : vector<2x128xf32>
      %19 = tpu.matmul %17, %18, %cst_17 {dimension_numbers = #tpu.dot_dimension_numbers<[1], [0], [0], [1], [0, 0, 1, 1], [], []>} : vector<2x8xf32>, vector<8x128xf32>, vector<2x128xf32> -> vector<2x128xf32>
      %c0_18 = arith.constant 0 : index
      %c0_19 = arith.constant 0 : index
      %20 = vector.load %arg6[%c0_18, %c0_19] : memref<1x128xf32, #tpu.memory_space<vmem>>, vector<1x128xf32>
      %21 = vector.broadcast %20 : vector<1x128xf32> to vector<2x128xf32>
      %22 = arith.addf %19, %21 : vector<2x128xf32>
      %c0_20 = arith.constant 0 : index
      %c0_21 = arith.constant 0 : index
      %23 = vector.load %arg7[%c0_20, %c0_21] : memref<2x128xf32, #tpu.memory_space<vmem>>, vector<2x128xf32>
      tpu.vector_store %arg7[%c0_20, %c0_21], %22 {strides = array<i32>} : memref<2x128xf32, #tpu.memory_space<vmem>>, vector<2x128xf32>,
    } else {
    }
    return
  }
  func.func @transform_0(%arg0: i32, %arg1: i32) -> (i32, i32) {
    %c0_i32 = arith.constant 0 : i32
    return %arg0, %arg1 : i32, i32
  }
  func.func @transform_1(%arg0: i32, %arg1: i32) -> (i32, i32) {
    %c0_i32 = arith.constant 0 : i32
    %c0_i32_0 = arith.constant 0 : i32
    return %arg1, %c0_i32 : i32, i32
  }
  func.func @transform_2(%arg0: i32, %arg1: i32) -> (i32, i32) {
    %c0_i32 = arith.constant 0 : i32
    %c0_i32_0 = arith.constant 0 : i32
    %c0_i32_1 = arith.constant 0 : i32
    return %c0_i32, %c0_i32_0 : i32, i32
  }
  func.func @transform_3(%arg0: i32, %arg1: i32) -> (i32, i32) {
    %c0_i32 = arith.constant 0 : i32
    %c0_i32_0 = arith.constant 0 : i32
    %c0_i32_1 = arith.constant 0 : i32
    return %c0_i32, %c0_i32_0 : i32, i32
  }
  func.func @transform_4(%arg0: i32, %arg1: i32) -> (i32, i32) {
    %c0_i32 = arith.constant 0 : i32
    %c0_i32_0 = arith.constant 0 : i32
    %c0_i32_1 = arith.constant 0 : i32
    return %c0_i32, %c0_i32_0 : i32, i32
  }
  func.func @transform_5(%arg0: i32, %arg1: i32) -> (i32, i32) {
    %c0_i32 = arith.constant 0 : i32
    %c0_i32_0 = arith.constant 0 : i32
    return %arg0, %c0_i32 : i32, i32
  }
}

</mosaic_0001>

<bundles_post_ra>
// kernel: tpu_custom_call.1
= control target key start
LH: loop header
LB: loop body
LE: loop exit
PB: predicated region body
PF: predicated region fallthrough
CT: control target
= control target key end

     0   :  { %s1586_s0 = inlined_call_operand.vmem [shape: f32[2,2048], index: 0, kind: input, shape index: {}]   ;;  %s1587_s1 = inlined_call_operand.vmem [shape: f32[2048,8], index: 1, kind: input, shape index: {}]   ;;  %s1588_s2 = inlined_call_operand.vmem [shape: f32[1,8], index: 2, kind: input, shape index: {}]   ;;  %s1589_s3 = inlined_call_operand.vmem [shape: f32[8,128], index: 3, kind: input, shape index: {}]   ;;  %s1590_s4 = inlined_call_operand.vmem [shape: f32[1,128], index: 4, kind: input, shape index: {}]   ;;  %s1591_s5 = inlined_call_operand.hbm [shape: f32[2,128], index: 5, kind: output, shape index: {}]  }
   0x1   :  { %v47_v0 = vld [vmem:[%s1587_s1 + $0x78] sm:$0xff]  ;;  %v46_v2 = vld [vmem:[%s1587_s1 + $0x70] sm:$0xff]  ;;  %v45_v6 = vld [vmem:[%s1587_s1 + $0x68] sm:$0xff] }
   0x2   :  { %v79_v1 = vld [vmem:[%s1587_s1 + $0x178] sm:$0xff]  ;;  %329 = vmatpush.msra.mxu0 %v47_v0  ;;  %v78_v4 = vld [vmem:[%s1587_s1 + $0x170] sm:$0xff]  ;;  %v77_v8 = vld [vmem:[%s1587_s1 + $0x168] sm:$0xff] }
   0x3   :  { %369 = vmatpush.msra.mxu2 %v79_v1  ;;  %v63_v3 = vld [vmem:[%s1587_s1 + $0xf8] sm:$0xff]  ;;  %v62_v7 = vld [vmem:[%s1587_s1 + $0xf0] sm:$0xff]  ;;  %v61_v10 = vld [vmem:[%s1587_s1 + $0xe8] sm:$0xff] }
   0x4   :  { %v95_v5 = vld [vmem:[%s1587_s1 + $0x1f8] sm:$0xff]  ;;  %349 = vmatpush.msra.mxu1 %v63_v3  ;;  %330 = vmatpush.msra.mxu0 %v46_v2  ;;  %v94_v9 = vld [vmem:[%s1587_s1 + $0x1f0] sm:$0xff]  ;;  %v44_v11 = vld [vmem:[%s1587_s1 + $0x60] sm:$0xff] }
   0x5   :  { %389 = vmatpush.msra.mxu3 %v95_v5  ;;  %370 = vmatpush.msra.mxu2 %v78_v4  ;;  %v76_v12 = vld [vmem:[%s1587_s1 + $0x160] sm:$0xff]  ;;  %v93_v13 = vld [vmem:[%s1587_s1 + $0x1e8] sm:$0xff]  ;;  %v43_v16 = vld [vmem:[%s1587_s1 + $0x58] sm:$0xff] }
   0x6   :  { %350 = vmatpush.msra.mxu1 %v62_v7  ;;  %331 = vmatpush.msra.mxu0 %v45_v6  ;;  %v60_v14 = vld [vmem:[%s1587_s1 + $0xe0] sm:$0xff]  ;;  %v75_v17 = vld [vmem:[%s1587_s1 + $0x158] sm:$0xff]  ;;  %v42_v20 = vld [vmem:[%s1587_s1 + $0x50] sm:$0xff] }
   0x7   :  { %390 = vmatpush.msra.mxu3 %v94_v9  ;;  %371 = vmatpush.msra.mxu2 %v77_v8  ;;  %v92_v15 = vld [vmem:[%s1587_s1 + $0x1e0] sm:$0xff]  ;;  %v59_v18 = vld [vmem:[%s1587_s1 + $0xd8] sm:$0xff]  ;;  %v74_v21 = vld [vmem:[%s1587_s1 + $0x150] sm:$0xff] }
   0x8   :  { %351 = vmatpush.msra.mxu1 %v61_v10  ;;  %332 = vmatpush.msra.mxu0 %v44_v11  ;;  %v91_v19 = vld [vmem:[%s1587_s1 + $0x1d8] sm:$0xff]  ;;  %v58_v22 = vld [vmem:[%s1587_s1 + $0xd0] sm:$0xff]  ;;  %v41_v24 = vld [vmem:[%s1587_s1 + $0x48] sm:$0xff] }
   0x9   :  { %391 = vmatpush.msra.mxu3 %v93_v13  ;;  %372 = vmatpush.msra.mxu2 %v76_v12  ;;  %v90_v23 = vld [vmem:[%s1587_s1 + $0x1d0] sm:$0xff]  ;;  %v73_v25 = vld [vmem:[%s1587_s1 + $0x148] sm:$0xff]  ;;  %v40_v28 = vld [vmem:[%s1587_s1 + $0x40] sm:$0xff] }
   0xa   :  { %352 = vmatpush.msra.mxu1 %v60_v14  ;;  %333 = vmatpush.msra.mxu0 %v43_v16  ;;  %v57_v26 = vld [vmem:[%s1587_s1 + $0xc8] sm:$0xff]  ;;  %v72_v29 = vld [vmem:[%s1587_s1 + $0x140] sm:$0xff]  ;;  %v39_v32 = vld [vmem:[%s1587_s1 + $0x38] sm:$0xff] }
   0xb   :  { %392 = vmatpush.msra.mxu3 %v92_v15  ;;  %373 = vmatpush.msra.mxu2 %v75_v17  ;;  %v89_v27 = vld [vmem:[%s1587_s1 + $0x1c8] sm:$0xff]  ;;  %v56_v30 = vld [vmem:[%s1587_s1 + $0xc0] sm:$0xff]  ;;  %v71_v33 = vld [vmem:[%s1587_s1 + $0x138] sm:$0xff] }
   0xc   :  { %353 = vmatpush.msra.mxu1 %v59_v18  ;;  %334 = vmatpush.msra.mxu0 %v42_v20  ;;  %v88_v31 = vld [vmem:[%s1587_s1 + $0x1c0] sm:$0xff]  ;;  %v55_v34 = vld [vmem:[%s1587_s1 + $0xb8] sm:$0xff]  ;;  %v38_v36 = vld [vmem:[%s1587_s1 + $0x30] sm:$0xff] }
   0xd   :  { %393 = vmatpush.msra.mxu3 %v91_v19  ;;  %374 = vmatpush.msra.mxu2 %v74_v21  ;;  %v87_v35 = vld [vmem:[%s1587_s1 + $0x1b8] sm:$0xff]  ;;  %v70_v37 = vld [vmem:[%s1587_s1 + $0x130] sm:$0xff]  ;;  %v37_v40 = vld [vmem:[%s1587_s1 + $0x28] sm:$0xff] }
   0xe   :  { %354 = vmatpush.msra.mxu1 %v58_v22  ;;  %335 = vmatpush.msra.mxu0 %v41_v24  ;;  %v54_v38 = vld [vmem:[%s1587_s1 + $0xb0] sm:$0xff]  ;;  %v69_v41 = vld [vmem:[%s1587_s1 + $0x128] sm:$0xff]  ;;  %v36_v44 = vld [vmem:[%s1587_s1 + $0x20] sm:$0xff] }
   0xf   :  { %394 = vmatpush.msra.mxu3 %v90_v23  ;;  %375 = vmatpush.msra.mxu2 %v73_v25  ;;  %v86_v39 = vld [vmem:[%s1587_s1 + $0x1b0] sm:$0xff]  ;;  %v53_v42 = vld [vmem:[%s1587_s1 + $0xa8] sm:$0xff]  ;;  %v68_v45 = vld [vmem:[%s1587_s1 + $0x120] sm:$0xff] }
  0x10   :  { %355 = vmatpush.msra.mxu1 %v57_v26  ;;  %336 = vmatpush.msra.mxu0 %v40_v28  ;;  %v85_v43 = vld [vmem:[%s1587_s1 + $0x1a8] sm:$0xff]  ;;  %v52_v46 = vld [vmem:[%s1587_s1 + $0xa0] sm:$0xff]  ;;  %v35_v48 = vld [vmem:[%s1587_s1 + $0x18] sm:$0xff] }
  0x11   :  { %395 = vmatpush.msra.mxu3 %v89_v27  ;;  %376 = vmatpush.msra.mxu2 %v72_v29  ;;  %v84_v47 = vld [vmem:[%s1587_s1 + $0x1a0] sm:$0xff]  ;;  %v67_v49 = vld [vmem:[%s1587_s1 + $0x118] sm:$0xff]  ;;  %v34_v52 = vld [vmem:[%s1587_s1 + $0x10] sm:$0xff] }
  0x12   :  { %356 = vmatpush.msra.mxu1 %v56_v30  ;;  %337 = vmatpush.msra.mxu0 %v39_v32  ;;  %v51_v50 = vld [vmem:[%s1587_s1 + $0x98] sm:$0xff]  ;;  %v66_v53 = vld [vmem:[%s1587_s1 + $0x110] sm:$0xff]  ;;  %v33_v56 = vld [vmem:[%s1587_s1 + $0x8] sm:$0xff] }
  0x13   :  { %396 = vmatpush.msra.mxu3 %v88_v31  ;;  %377 = vmatpush.msra.mxu2 %v71_v33  ;;  %v83_v51 = vld [vmem:[%s1587_s1 + $0x198] sm:$0xff]  ;;  %v50_v54 = vld [vmem:[%s1587_s1 + $0x90] sm:$0xff]  ;;  %v65_v57 = vld [vmem:[%s1587_s1 + $0x108] sm:$0xff] }
  0x14   :  { %357 = vmatpush.msra.mxu1 %v55_v34  ;;  %338 = vmatpush.msra.mxu0 %v38_v36  ;;  %v82_v55 = vld [vmem:[%s1587_s1 + $0x190] sm:$0xff]  ;;  %v49_v58 = vld [vmem:[%s1587_s1 + $0x88] sm:$0xff]  ;;  %v32_v60 = vld [vmem:[%s1587_s1] sm:$0xff] }
  0x15   :  { %397 = vmatpush.msra.mxu3 %v87_v35  ;;  %378 = vmatpush.msra.mxu2 %v70_v37  ;;  %v81_v59 = vld [vmem:[%s1587_s1 + $0x188] sm:$0xff]  ;;  %v64_v61 = vld [vmem:[%s1587_s1 + $0x100] sm:$0xff]  ;;  %v111_v62 = vld [vmem:[%s1587_s1 + $0x278] sm:$0xff] }
  0x16   :  { %358 = vmatpush.msra.mxu1 %v54_v38  ;;  %339 = vmatpush.msra.mxu0 %v37_v40  ;;  %v143_v63 = vld [vmem:[%s1587_s1 + $0x378] sm:$0xff]  ;;  %v48_v0 = vld [vmem:[%s1587_s1 + $0x80] sm:$0xff]  ;;  %v110_v2 = vld [vmem:[%s1587_s1 + $0x270] sm:$0xff] }
  0x17   :  { %398 = vmatpush.msra.mxu3 %v86_v39  ;;  %379 = vmatpush.msra.mxu2 %v69_v41  ;;  %v80_v1 = vld [vmem:[%s1587_s1 + $0x180] sm:$0xff]  ;;  %v127_v3 = vld [vmem:[%s1587_s1 + $0x2f8] sm:$0xff]  ;;  %v142_v4 = vld [vmem:[%s1587_s1 + $0x370] sm:$0xff] }
  0x18   :  { %359 = vmatpush.msra.mxu1 %v53_v42  ;;  %340 = vmatpush.msra.mxu0 %v36_v44  ;;  %v159_v5 = vld [vmem:[%s1587_s1 + $0x3f8] sm:$0xff]  ;;  %v109_v6 = vld [vmem:[%s1587_s1 + $0x268] sm:$0xff]  ;;  %v126_v7 = vld [vmem:[%s1587_s1 + $0x2f0] sm:$0xff] }
  0x19   :  { %399 = vmatpush.msra.mxu3 %v85_v43  ;;  %380 = vmatpush.msra.mxu2 %v68_v45  ;;  %v141_v8 = vld [vmem:[%s1587_s1 + $0x368] sm:$0xff]  ;;  %v158_v9 = vld [vmem:[%s1587_s1 + $0x3f0] sm:$0xff]  ;;  %v108_v10 = vld [vmem:[%s1587_s1 + $0x260] sm:$0xff] }
  0x1a   :  { %360 = vmatpush.msra.mxu1 %v52_v46  ;;  %341 = vmatpush.msra.mxu0 %v35_v48  ;;  %v125_v11 = vld [vmem:[%s1587_s1 + $0x2e8] sm:$0xff]  ;;  %v140_v12 = vld [vmem:[%s1587_s1 + $0x360] sm:$0xff]  ;;  %v107_v14 = vld [vmem:[%s1587_s1 + $0x258] sm:$0xff] }
  0x1b   :  { %400 = vmatpush.msra.mxu3 %v84_v47  ;;  %381 = vmatpush.msra.mxu2 %v67_v49  ;;  %v157_v13 = vld [vmem:[%s1587_s1 + $0x3e8] sm:$0xff]  ;;  %v124_v15 = vld [vmem:[%s1587_s1 + $0x2e0] sm:$0xff]  ;;  %v139_v16 = vld [vmem:[%s1587_s1 + $0x358] sm:$0xff] }
  0x1c   :  { %361 = vmatpush.msra.mxu1 %v51_v50  ;;  %342 = vmatpush.msra.mxu0 %v34_v52  ;;  %v156_v17 = vld [vmem:[%s1587_s1 + $0x3e0] sm:$0xff]  ;;  %v106_v18 = vld [vmem:[%s1587_s1 + $0x250] sm:$0xff]  ;;  %v123_v19 = vld [vmem:[%s1587_s1 + $0x2d8] sm:$0xff] }
  0x1d   :  { %401 = vmatpush.msra.mxu3 %v83_v51  ;;  %382 = vmatpush.msra.mxu2 %v66_v53  ;;  %v138_v20 = vld [vmem:[%s1587_s1 + $0x350] sm:$0xff]  ;;  %v155_v21 = vld [vmem:[%s1587_s1 + $0x3d8] sm:$0xff]  ;;  %v28_v22 = vld [vmem:[%s1586_s0] sm:$0xff] }
  0x1e   :  { %362 = vmatpush.msra.mxu1 %v50_v54  ;;  %343 = vmatpush.msra.mxu0 %v33_v56  ;;  %v105_v23 = vld [vmem:[%s1587_s1 + $0x248] sm:$0xff]  ;;  %v122_v24 = vld [vmem:[%s1587_s1 + $0x2d0] sm:$0xff]  ;;  %292 = vst [vmem:[#allocation1] ss:$4 sm:$0xff] %v28_v22  ;;  %v104_v27 = vld [vmem:[%s1587_s1 + $0x240] sm:$0xff] }
  0x1f   :  { %402 = vmatpush.msra.mxu3 %v82_v55  ;;  %383 = vmatpush.msra.mxu2 %v65_v57  ;;  %v137_v25 = vld [vmem:[%s1587_s1 + $0x348] sm:$0xff]  ;;  %v154_v26 = vld [vmem:[%s1587_s1 + $0x3d0] sm:$0xff]  ;;  %v136_v29 = vld [vmem:[%s1587_s1 + $0x340] sm:$0xff] }
  0x20   :  { %363 = vmatpush.msra.mxu1 %v49_v58  ;;  %344 = vmatpush.msra.mxu0 %v32_v60  ;;  %v121_v28 = vld [vmem:[%s1587_s1 + $0x2c8] sm:$0xff]  ;;  %v103_v31 = vld [vmem:[%s1587_s1 + $0x238] sm:$0xff]  ;;  %v120_v32 = vld [vmem:[%s1587_s1 + $0x2c0] sm:$0xff] }
  0x21   :  { %403 = vmatpush.msra.mxu3 %v81_v59  ;;  %384 = vmatpush.msra.mxu2 %v64_v61  ;;  %v153_v30 = vld [vmem:[%s1587_s1 + $0x3c8] sm:$0xff]  ;;  %v135_v33 = vld [vmem:[%s1587_s1 + $0x338] sm:$0xff]  ;;  %v152_v34 = vld [vmem:[%s1587_s1 + $0x3c0] sm:$0xff] }
  0x22   :  { %409 = vmatpush.msrb.mxu0 %v111_v62  ;;  %364 = vmatpush.msra.mxu1 %v48_v0  ;;  %v102_v35 = vld [vmem:[%s1587_s1 + $0x230] sm:$0xff]  ;;  %v119_v36 = vld [vmem:[%s1587_s1 + $0x2b8] sm:$0xff]  ;;  %v29_v39 = vld [vmem:[%s1586_s0 + $0x8] sm:$0xff] }
  0x23   :  { %449 = vmatpush.msrb.mxu2 %v143_v63  ;;  %404 = vmatpush.msra.mxu3 %v80_v1  ;;  %v134_v37 = vld [vmem:[%s1587_s1 + $0x330] sm:$0xff]  ;;  %v151_v38 = vld [vmem:[%s1587_s1 + $0x3b8] sm:$0xff]  ;;  %v101_v40 = vld [vmem:[%s1587_s1 + $0x228] sm:$0xff]  ;;  %294 = vst [vmem:[#allocation1 + $0x20] ss:$4 sm:$0xff] %v29_v39 }
  0x24   :  { %410 = vmatpush.msrb.mxu0 %v110_v2  ;;  %429 = vmatpush.msrb.mxu1 %v127_v3  ;;  %v118_v41 = vld [vmem:[%s1587_s1 + $0x2b0] sm:$0xff]  ;;  %v133_v43 = vld [vmem:[%s1587_s1 + $0x328] sm:$0xff]  ;;  %v100_v49 = vld [vmem:[%s1587_s1 + $0x220] sm:$0xff] }
  0x25   :  { %450 = vmatpush.msrb.mxu2 %v142_v4  ;;  %469 = vmatpush.msrb.mxu3 %v159_v5  ;;  %v30_v42 = vld [vmem:[%s1586_s0 + $0x10] sm:$0xff]  ;;  %v1095_v45 = vld.sshfl [vmem:[#allocation1] sm:$0xff pattern:$0x73625140]  ;;  %v117_v50 = vld [vmem:[%s1587_s1 + $0x2a8] sm:$0xff] }
  0x26   :  { %411 = vmatpush.msrb.mxu0 %v109_v6  ;;  %430 = vmatpush.msrb.mxu1 %v126_v7  ;;  %v297_v44 = vld.sshfl [vmem:[#allocation1 + $0x10] sm:$0xff pattern:$0x73625140]  ;;  %v1097_v46 = vld.sshfl [vmem:[#allocation1 + $0x18] sm:$0xff pattern:$0x73625140] }
  0x27   :  { %451 = vmatpush.msrb.mxu2 %v141_v8  ;;  %470 = vmatpush.msrb.mxu3 %v158_v9  ;;  %v1099_v47 = vld.sshfl [vmem:[#allocation1 + $0x8] sm:$0xff pattern:$0x73625140]  ;;  %v150_v48 = vld [vmem:[%s1587_s1 + $0x3b0] sm:$0xff]  ;;  %v132_v51 = vld [vmem:[%s1587_s1 + $0x320] sm:$0xff] }
  0x28   :  { %412 = vmatpush.msrb.mxu0 %v108_v10  ;;  %431 = vmatpush.msrb.mxu1 %v125_v11  ;;  %303 = vst [vmem:[#allocation1] ss:$4 sm:$0xff] %v30_v42  ;;  %v149_v52 = vld [vmem:[%s1587_s1 + $0x3a8] sm:$0xff]  ;;  %v99_v53 = vld [vmem:[%s1587_s1 + $0x218] sm:$0xff]  ;;  %v116_v54 = vld [vmem:[%s1587_s1 + $0x2a0] sm:$0xff] }
  0x29   :  { %452 = vmatpush.msrb.mxu2 %v140_v12  ;;  %471 = vmatpush.msrb.mxu3 %v157_v13  ;;  %v131_v55 = vld [vmem:[%s1587_s1 + $0x318] sm:$0xff]  ;;  %v148_v56 = vld [vmem:[%s1587_s1 + $0x3a0] sm:$0xff]  ;;  %v98_v57 = vld [vmem:[%s1587_s1 + $0x210] sm:$0xff] }
  0x2a   :  { %413 = vmatpush.msrb.mxu0 %v107_v14  ;;  %432 = vmatpush.msrb.mxu1 %v124_v15  ;;  %v115_v58 = vld [vmem:[%s1587_s1 + $0x298] sm:$0xff]  ;;  %v1137_v60 = vld.sshfl [vmem:[#allocation1 + $0x30] sm:$0xff pattern:$0x73625140]  ;;  %v97_v2 = vld [vmem:[%s1587_s1 + $0x208] sm:$0xff] }
  0x2b   :  { %453 = vmatpush.msrb.mxu2 %v139_v16  ;;  %472 = vmatpush.msrb.mxu3 %v156_v17  ;;  %v31_v59 = vld [vmem:[%s1586_s0 + $0x18] sm:$0xff]  ;;  %v1139_v61 = vld.sshfl [vmem:[#allocation1 + $0x20] sm:$0xff pattern:$0x73625140]  ;;  %v130_v0 = vld [vmem:[%s1587_s1 + $0x310] sm:$0xff] }
  0x2c   :  { %414 = vmatpush.msrb.mxu0 %v106_v18  ;;  %433 = vmatpush.msrb.mxu1 %v123_v19  ;;  %v1141_v62 = vld.sshfl [vmem:[#allocation1 + $0x38] sm:$0xff pattern:$0x73625140]  ;;  %v1143_v63 = vld.sshfl [vmem:[#allocation1 + $0x28] sm:$0xff pattern:$0x73625140] }
  0x2d   :  { %454 = vmatpush.msrb.mxu2 %v138_v20  ;;  %473 = vmatpush.msrb.mxu3 %v155_v21  ;;  %v147_v1 = vld [vmem:[%s1587_s1 + $0x398] sm:$0xff]  ;;  %304 = vst [vmem:[#allocation1 + $0x20] ss:$4 sm:$0xff] %v31_v59  ;;  %v114_v3 = vld [vmem:[%s1587_s1 + $0x290] sm:$0xff]  ;;  %v129_v4 = vld [vmem:[%s1587_s1 + $0x308] sm:$0xff] }
  0x2e   :  { %415 = vmatpush.msrb.mxu0 %v105_v23  ;;  %434 = vmatpush.msrb.mxu1 %v122_v24  ;;  %v146_v5 = vld [vmem:[%s1587_s1 + $0x390] sm:$0xff]  ;;  %v96_v6 = vld [vmem:[%s1587_s1 + $0x200] sm:$0xff]  ;;  %v113_v7 = vld [vmem:[%s1587_s1 + $0x288] sm:$0xff] }
  0x2f   :  { %455 = vmatpush.msrb.mxu2 %v137_v25  ;;  %474 = vmatpush.msrb.mxu3 %v154_v26  ;;  %v128_v8 = vld [vmem:[%s1587_s1 + $0x300] sm:$0xff]  ;;  %v145_v9 = vld [vmem:[%s1587_s1 + $0x388] sm:$0xff]  ;;  %v175_v10 = vld [vmem:[%s1587_s1 + $0x478] sm:$0xff] }
  0x30   :  { %416 = vmatpush.msrb.mxu0 %v104_v27  ;;  %435 = vmatpush.msrb.mxu1 %v121_v28  ;;  %v207_v11 = vld [vmem:[%s1587_s1 + $0x578] sm:$0xff]  ;;  %v112_v12 = vld [vmem:[%s1587_s1 + $0x280] sm:$0xff]  ;;  %v174_v14 = vld [vmem:[%s1587_s1 + $0x470] sm:$0xff] }
  0x31   :  { %456 = vmatpush.msrb.mxu2 %v136_v29  ;;  %475 = vmatpush.msrb.mxu3 %v153_v30  ;;  %v144_v13 = vld [vmem:[%s1587_s1 + $0x380] sm:$0xff]  ;;  %v191_v15 = vld [vmem:[%s1587_s1 + $0x4f8] sm:$0xff]  ;;  %v206_v16 = vld [vmem:[%s1587_s1 + $0x570] sm:$0xff] }
  0x32   :  { %417 = vmatpush.msrb.mxu0 %v103_v31  ;;  %436 = vmatpush.msrb.mxu1 %v120_v32  ;;  %v223_v17 = vld [vmem:[%s1587_s1 + $0x5f8] sm:$0xff]  ;;  %v173_v18 = vld [vmem:[%s1587_s1 + $0x468] sm:$0xff]  ;;  %v190_v19 = vld [vmem:[%s1587_s1 + $0x4f0] sm:$0xff] }
  0x33   :  { %457 = vmatpush.msrb.mxu2 %v135_v33  ;;  %476 = vmatpush.msrb.mxu3 %v152_v34  ;;  %v205_v20 = vld [vmem:[%s1587_s1 + $0x568] sm:$0xff]  ;;  %v222_v21 = vld [vmem:[%s1587_s1 + $0x5f0] sm:$0xff]  ;;  %v172_v22 = vld [vmem:[%s1587_s1 + $0x460] sm:$0xff] }
  0x34   :  { %418 = vmatpush.msrb.mxu0 %v102_v35  ;;  %437 = vmatpush.msrb.mxu1 %v119_v36  ;;  %v189_v23 = vld [vmem:[%s1587_s1 + $0x4e8] sm:$0xff]  ;;  %v204_v24 = vld [vmem:[%s1587_s1 + $0x560] sm:$0xff]  ;;  %v171_v26 = vld [vmem:[%s1587_s1 + $0x458] sm:$0xff] }
  0x35   :  { %458 = vmatpush.msrb.mxu2 %v134_v37  ;;  %477 = vmatpush.msrb.mxu3 %v151_v38  ;;  %v221_v25 = vld [vmem:[%s1587_s1 + $0x5e8] sm:$0xff]  ;;  %v188_v27 = vld [vmem:[%s1587_s1 + $0x4e0] sm:$0xff]  ;;  %v203_v28 = vld [vmem:[%s1587_s1 + $0x558] sm:$0xff] }
  0x36   :  { %419 = vmatpush.msrb.mxu0 %v101_v40  ;;  %438 = vmatpush.msrb.mxu1 %v118_v41 }
  0x37   :  { %459 = vmatpush.msrb.mxu2 %v133_v43  ;;  %478 = vmatpush.msrb.mxu3 %v150_v48 }
  0x38   :  { %420 = vmatpush.msrb.mxu0 %v100_v49  ;;  %439 = vmatpush.msrb.mxu1 %v117_v50 }
  0x39   :  { %460 = vmatpush.msrb.mxu2 %v132_v51  ;;  %479 = vmatpush.msrb.mxu3 %v149_v52 }
  0x3a   :  { %421 = vmatpush.msrb.mxu0 %v99_v53  ;;  %440 = vmatpush.msrb.mxu1 %v116_v54 }
  0x3b   :  { %461 = vmatpush.msrb.mxu2 %v131_v55  ;;  %480 = vmatpush.msrb.mxu3 %v148_v56 }
  0x3c   :  { %422 = vmatpush.msrb.mxu0 %v98_v57  ;;  %441 = vmatpush.msrb.mxu1 %v115_v58 }
  0x3d   :  { %462 = vmatpush.msrb.mxu2 %v130_v0  ;;  %481 = vmatpush.msrb.mxu3 %v147_v1 }
  0x3e   :  { %423 = vmatpush.msrb.mxu0 %v97_v2  ;;  %442 = vmatpush.msrb.mxu1 %v114_v3 }
  0x3f   :  { %463 = vmatpush.msrb.mxu2 %v129_v4  ;;  %482 = vmatpush.msrb.mxu3 %v146_v5 }
  0x40   :  { %385 = vmatmul.f32.vlgmr.msra.gmra.mxu2 %v297_v44  ;;  %424 = vmatpush.msrb.mxu0 %v96_v6 }
  0x41   :  { %443 = vmatpush.msrb.mxu1 %v113_v7  ;;  %464 = vmatpush.msrb.mxu2 %v128_v8 }
  0x42   :  { %483 = vmatpush.msrb.mxu3 %v145_v9  ;;  %345 = vmatmul.f32.vlgmr.msra.gmra.mxu0 %v1095_v45 }
  0x43   :  { %405 = vmatmul.f32.vlgmr.msra.gmra.mxu3 %v1097_v46  ;;  %489 = vmatpush.msra.mxu0 %v175_v10 }
  0x44   :  { %529 = vmatpush.msra.mxu2 %v207_v11  ;;  %444 = vmatpush.msrb.mxu1 %v112_v12 }
  0x45   :  { %484 = vmatpush.msrb.mxu3 %v144_v13  ;;  %365 = vmatmul.f32.vlgmr.msra.gmra.mxu1 %v1099_v47 }
  0x46   :  { %490 = vmatpush.msra.mxu0 %v174_v14  ;;  %509 = vmatpush.msra.mxu1 %v191_v15 }
  0x47   :  { %530 = vmatpush.msra.mxu2 %v206_v16  ;;  %549 = vmatpush.msra.mxu3 %v223_v17 }
  0x48   :  { %491 = vmatpush.msra.mxu0 %v173_v18  ;;  %510 = vmatpush.msra.mxu1 %v190_v19 }
  0x49   :  { %531 = vmatpush.msra.mxu2 %v205_v20  ;;  %550 = vmatpush.msra.mxu3 %v222_v21 }
  0x4a   :  { %465 = vmatmul.f32.vlgmr.msrb.gmra.mxu2 %v1137_v60  ;;  %492 = vmatpush.msra.mxu0 %v172_v22 }
  0x4b   :  { %511 = vmatpush.msra.mxu1 %v189_v23  ;;  %532 = vmatpush.msra.mxu2 %v204_v24 }
  0x4c   :  { %10 = vsyncpa [#allocation4], 0  ;;  %551 = vmatpush.msra.mxu3 %v221_v25  ;;  %425 = vmatmul.f32.vlgmr.msrb.gmra.mxu0 %v1139_v61  ;;  %v220_v29 = vld [vmem:[%s1587_s1 + $0x5e0] sm:$0xff]  ;;  %v170_v30 = vld [vmem:[%s1587_s1 + $0x450] sm:$0xff]  ;;  %vm25_vm0 = vcmask 58368   ;;  %vm667_vm1 = vcmask 64512  }
  0x4d   :  { %485 = vmatmul.f32.vlgmr.msrb.gmra.mxu3 %v1141_v62  ;;  %493 = vmatpush.msra.mxu0 %v171_v26  ;;  %v187_v31 = vld [vmem:[%s1587_s1 + $0x4d8] sm:$0xff]  ;;  %v202_v32 = vld [vmem:[%s1587_s1 + $0x550] sm:$0xff]  ;;  %v169_v34 = vld [vmem:[%s1587_s1 + $0x448] sm:$0xff]  ;;  %s740_s6 = smov [#allocation3]   ;;  %s699_s10 = sshll.u32 %s1591_s5, 4  ;;  %s700_s10 = int_to_ptr.hbm [resolvable:$true] %s699_s10 }
  0x4e   :  { %512 = vmatpush.msra.mxu1 %v188_v27  ;;  %533 = vmatpush.msra.mxu2 %v203_v28  ;;  %v219_v33 = vld [vmem:[%s1587_s1 + $0x5d8] sm:$0xff]  ;;  %v186_v35 = vld [vmem:[%s1587_s1 + $0x4d0] sm:$0xff]  ;;  %v201_v36 = vld [vmem:[%s1587_s1 + $0x548] sm:$0xff]  ;;  %s697_s7 = sshll.u32 %s740_s6, 4  ;;  %s698_s7 = int_to_ptr.vmem [resolvable:$true] %s697_s7 }
  0x4f   :  { %552 = vmatpush.msra.mxu3 %v220_v29  ;;  %445 = vmatmul.f32.vlgmr.msrb.gmra.mxu1 %v1143_v63  ;;  %v218_v37 = vld [vmem:[%s1587_s1 + $0x5d0] sm:$0xff]  ;;  %v168_v38 = vld [vmem:[%s1587_s1 + $0x440] sm:$0xff]  ;;  %v185_v39 = vld [vmem:[%s1587_s1 + $0x4c8] sm:$0xff] }
  0x50   :  { %494 = vmatpush.msra.mxu0 %v170_v30  ;;  %513 = vmatpush.msra.mxu1 %v187_v31  ;;  %v200_v40 = vld [vmem:[%s1587_s1 + $0x540] sm:$0xff]  ;;  %v217_v41 = vld [vmem:[%s1587_s1 + $0x5c8] sm:$0xff]  ;;  %v167_v42 = vld [vmem:[%s1587_s1 + $0x438] sm:$0xff] }
  0x51   :  { %534 = vmatpush.msra.mxu2 %v202_v32  ;;  %553 = vmatpush.msra.mxu3 %v219_v33  ;;  %v184_v43 = vld [vmem:[%s1587_s1 + $0x4c0] sm:$0xff]  ;;  %v199_v44 = vld [vmem:[%s1587_s1 + $0x538] sm:$0xff]  ;;  %v166_v46 = vld [vmem:[%s1587_s1 + $0x430] sm:$0xff] }
  0x52   :  { %495 = vmatpush.msra.mxu0 %v169_v34  ;;  %514 = vmatpush.msra.mxu1 %v186_v35  ;;  %v216_v45 = vld [vmem:[%s1587_s1 + $0x5c0] sm:$0xff]  ;;  %v183_v47 = vld [vmem:[%s1587_s1 + $0x4b8] sm:$0xff]  ;;  %v198_v48 = vld [vmem:[%s1587_s1 + $0x530] sm:$0xff] }
  0x53   :  { %535 = vmatpush.msra.mxu2 %v201_v36  ;;  %554 = vmatpush.msra.mxu3 %v218_v37  ;;  %v215_v49 = vld [vmem:[%s1587_s1 + $0x5b8] sm:$0xff]  ;;  %v165_v50 = vld [vmem:[%s1587_s1 + $0x428] sm:$0xff]  ;;  %v182_v51 = vld [vmem:[%s1587_s1 + $0x4b0] sm:$0xff] }
  0x54   :  { %496 = vmatpush.msra.mxu0 %v168_v38  ;;  %515 = vmatpush.msra.mxu1 %v185_v39  ;;  %v197_v52 = vld [vmem:[%s1587_s1 + $0x528] sm:$0xff]  ;;  %v214_v53 = vld [vmem:[%s1587_s1 + $0x5b0] sm:$0xff]  ;;  %v164_v54 = vld [vmem:[%s1587_s1 + $0x420] sm:$0xff] }
  0x55   :  { %536 = vmatpush.msra.mxu2 %v200_v40  ;;  %555 = vmatpush.msra.mxu3 %v217_v41  ;;  %v181_v55 = vld [vmem:[%s1587_s1 + $0x4a8] sm:$0xff]  ;;  %v196_v56 = vld [vmem:[%s1587_s1 + $0x520] sm:$0xff]  ;;  %v163_v58 = vld [vmem:[%s1587_s1 + $0x418] sm:$0xff] }
  0x56   :  { %497 = vmatpush.msra.mxu0 %v167_v42  ;;  %516 = vmatpush.msra.mxu1 %v184_v43  ;;  %v213_v57 = vld [vmem:[%s1587_s1 + $0x5a8] sm:$0xff]  ;;  %v180_v59 = vld [vmem:[%s1587_s1 + $0x4a0] sm:$0xff]  ;;  %v195_v60 = vld [vmem:[%s1587_s1 + $0x518] sm:$0xff] }
  0x57   :  { %537 = vmatpush.msra.mxu2 %v199_v44  ;;  %556 = vmatpush.msra.mxu3 %v216_v45  ;;  %v212_v61 = vld [vmem:[%s1587_s1 + $0x5a0] sm:$0xff]  ;;  %v162_v62 = vld [vmem:[%s1587_s1 + $0x410] sm:$0xff]  ;;  %v179_v63 = vld [vmem:[%s1587_s1 + $0x498] sm:$0xff] }
  0x58   :  { %498 = vmatpush.msra.mxu0 %v166_v46  ;;  %517 = vmatpush.msra.mxu1 %v183_v47  ;;  %v194_v0 = vld [vmem:[%s1587_s1 + $0x510] sm:$0xff]  ;;  %v211_v1 = vld [vmem:[%s1587_s1 + $0x598] sm:$0xff]  ;;  %v161_v2 = vld [vmem:[%s1587_s1 + $0x408] sm:$0xff] }
  0x59   :  { %538 = vmatpush.msra.mxu2 %v198_v48  ;;  %557 = vmatpush.msra.mxu3 %v215_v49  ;;  %v178_v3 = vld [vmem:[%s1587_s1 + $0x490] sm:$0xff]  ;;  %v193_v4 = vld [vmem:[%s1587_s1 + $0x508] sm:$0xff]  ;;  %v160_v6 = vld [vmem:[%s1587_s1 + $0x400] sm:$0xff] }
  0x5a   :  { %499 = vmatpush.msra.mxu0 %v165_v50  ;;  %518 = vmatpush.msra.mxu1 %v182_v51  ;;  %v210_v5 = vld [vmem:[%s1587_s1 + $0x590] sm:$0xff]  ;;  %v177_v7 = vld [vmem:[%s1587_s1 + $0x488] sm:$0xff]  ;;  %v192_v8 = vld [vmem:[%s1587_s1 + $0x500] sm:$0xff] }
  0x5b   :  { %539 = vmatpush.msra.mxu2 %v197_v52  ;;  %558 = vmatpush.msra.mxu3 %v214_v53  ;;  %v209_v9 = vld [vmem:[%s1587_s1 + $0x588] sm:$0xff]  ;;  %v305_v10 = vld.sshfl [vmem:[#allocation1] sm:$0xff pattern:$0x73625140]  ;;  %v239_v12 = vld [vmem:[%s1587_s1 + $0x678] sm:$0xff] }
  0x5c   :  { %500 = vmatpush.msra.mxu0 %v164_v54  ;;  %519 = vmatpush.msra.mxu1 %v181_v55  ;;  %v307_v11 = vld.sshfl [vmem:[#allocation1 + $0x10] sm:$0xff pattern:$0x73625140]  ;;  %v271_v13 = vld [vmem:[%s1587_s1 + $0x778] sm:$0xff]  ;;  %v176_v14 = vld [vmem:[%s1587_s1 + $0x480] sm:$0xff] }
  0x5d   :  { %540 = vmatpush.msra.mxu2 %v196_v56  ;;  %559 = vmatpush.msra.mxu3 %v213_v57  ;;  %v208_v15 = vld [vmem:[%s1587_s1 + $0x580] sm:$0xff]  ;;  %v306_v16 = vld.sshfl [vmem:[#allocation1 + $0x8] sm:$0xff pattern:$0x73625140]  ;;  %v238_v18 = vld [vmem:[%s1587_s1 + $0x670] sm:$0xff] }
  0x5e   :  { %501 = vmatpush.msra.mxu0 %v163_v58  ;;  %520 = vmatpush.msra.mxu1 %v180_v59  ;;  %v308_v17 = vld.sshfl [vmem:[#allocation1 + $0x18] sm:$0xff pattern:$0x73625140]  ;;  %v270_v20 = vld [vmem:[%s1587_s1 + $0x770] sm:$0xff]  ;;  %v237_v22 = vld [vmem:[%s1587_s1 + $0x668] sm:$0xff] }
  0x5f   :  { %541 = vmatpush.msra.mxu2 %v195_v60  ;;  %560 = vmatpush.msra.mxu3 %v212_v61  ;;  %v255_v19 = vld [vmem:[%s1587_s1 + $0x6f8] sm:$0xff]  ;;  %v254_v23 = vld [vmem:[%s1587_s1 + $0x6f0] sm:$0xff]  ;;  %v269_v24 = vld [vmem:[%s1587_s1 + $0x768] sm:$0xff] }
  0x60   :  { %502 = vmatpush.msra.mxu0 %v162_v62  ;;  %521 = vmatpush.msra.mxu1 %v179_v63  ;;  %v287_v21 = vld [vmem:[%s1587_s1 + $0x7f8] sm:$0xff]  ;;  %v286_v25 = vld [vmem:[%s1587_s1 + $0x7f0] sm:$0xff]  ;;  %v236_v26 = vld [vmem:[%s1587_s1 + $0x660] sm:$0xff] }
  0x61   :  { %542 = vmatpush.msra.mxu2 %v194_v0  ;;  %561 = vmatpush.msra.mxu3 %v211_v1  ;;  %v253_v27 = vld [vmem:[%s1587_s1 + $0x6e8] sm:$0xff]  ;;  %v268_v28 = vld [vmem:[%s1587_s1 + $0x760] sm:$0xff]  ;;  %v235_v30 = vld [vmem:[%s1587_s1 + $0x658] sm:$0xff] }
  0x62   :  { %503 = vmatpush.msra.mxu0 %v161_v2  ;;  %522 = vmatpush.msra.mxu1 %v178_v3  ;;  %v285_v29 = vld [vmem:[%s1587_s1 + $0x7e8] sm:$0xff]  ;;  %v252_v31 = vld [vmem:[%s1587_s1 + $0x6e0] sm:$0xff]  ;;  %v267_v32 = vld [vmem:[%s1587_s1 + $0x758] sm:$0xff] }
  0x63   :  { %543 = vmatpush.msra.mxu2 %v193_v4  ;;  %562 = vmatpush.msra.mxu3 %v210_v5  ;;  %v284_v33 = vld [vmem:[%s1587_s1 + $0x7e0] sm:$0xff]  ;;  %v234_v34 = vld [vmem:[%s1587_s1 + $0x650] sm:$0xff]  ;;  %v251_v35 = vld [vmem:[%s1587_s1 + $0x6d8] sm:$0xff] }
  0x64   :  { %504 = vmatpush.msra.mxu0 %v160_v6  ;;  %523 = vmatpush.msra.mxu1 %v177_v7  ;;  %v266_v36 = vld [vmem:[%s1587_s1 + $0x750] sm:$0xff]  ;;  %v283_v37 = vld [vmem:[%s1587_s1 + $0x7d8] sm:$0xff]  ;;  %v233_v38 = vld [vmem:[%s1587_s1 + $0x648] sm:$0xff] }
  0x65   :  { %544 = vmatpush.msra.mxu2 %v192_v8  ;;  %563 = vmatpush.msra.mxu3 %v209_v9  ;;  %v250_v39 = vld [vmem:[%s1587_s1 + $0x6d0] sm:$0xff]  ;;  %v265_v40 = vld [vmem:[%s1587_s1 + $0x748] sm:$0xff]  ;;  %v232_v42 = vld [vmem:[%s1587_s1 + $0x640] sm:$0xff] }
  0x66   :  { %505 = vmatmul.f32.vlgmr.msra.gmra.mxu0 %v305_v10  ;;  %545 = vmatmul.f32.vlgmr.msra.gmra.mxu2 %v307_v11  ;;  %v282_v41 = vld [vmem:[%s1587_s1 + $0x7d0] sm:$0xff]  ;;  %v249_v43 = vld [vmem:[%s1587_s1 + $0x6c8] sm:$0xff]  ;;  %v264_v44 = vld [vmem:[%s1587_s1 + $0x740] sm:$0xff] }
  0x67   :  { %569 = vmatpush.msrb.mxu0 %v239_v12  ;;  %609 = vmatpush.msrb.mxu2 %v271_v13  ;;  %v281_v45 = vld [vmem:[%s1587_s1 + $0x7c8] sm:$0xff]  ;;  %v231_v46 = vld [vmem:[%s1587_s1 + $0x638] sm:$0xff]  ;;  %v248_v47 = vld [vmem:[%s1587_s1 + $0x6c0] sm:$0xff] }
  0x68   :  { %524 = vmatpush.msra.mxu1 %v176_v14  ;;  %564 = vmatpush.msra.mxu3 %v208_v15  ;;  %v263_v48 = vld [vmem:[%s1587_s1 + $0x738] sm:$0xff]  ;;  %v280_v49 = vld [vmem:[%s1587_s1 + $0x7c0] sm:$0xff]  ;;  %v230_v50 = vld [vmem:[%s1587_s1 + $0x630] sm:$0xff] }
  0x69   :  { %525 = vmatmul.f32.vlgmr.msra.gmra.mxu1 %v306_v16  ;;  %565 = vmatmul.f32.vlgmr.msra.gmra.mxu3 %v308_v17  ;;  %v247_v51 = vld [vmem:[%s1587_s1 + $0x6b8] sm:$0xff]  ;;  %v262_v52 = vld [vmem:[%s1587_s1 + $0x730] sm:$0xff]  ;;  %v229_v54 = vld [vmem:[%s1587_s1 + $0x628] sm:$0xff] }
  0x6a   :  { %570 = vmatpush.msrb.mxu0 %v238_v18  ;;  %589 = vmatpush.msrb.mxu1 %v255_v19  ;;  %v279_v53 = vld [vmem:[%s1587_s1 + $0x7b8] sm:$0xff]  ;;  %v246_v55 = vld [vmem:[%s1587_s1 + $0x6b0] sm:$0xff]  ;;  %v261_v56 = vld [vmem:[%s1587_s1 + $0x728] sm:$0xff] }
  0x6b   :  { %610 = vmatpush.msrb.mxu2 %v270_v20  ;;  %629 = vmatpush.msrb.mxu3 %v287_v21  ;;  %v278_v57 = vld [vmem:[%s1587_s1 + $0x7b0] sm:$0xff]  ;;  %v228_v58 = vld [vmem:[%s1587_s1 + $0x620] sm:$0xff]  ;;  %v245_v59 = vld [vmem:[%s1587_s1 + $0x6a8] sm:$0xff] }
  0x6c   :  { %571 = vmatpush.msrb.mxu0 %v237_v22  ;;  %590 = vmatpush.msrb.mxu1 %v254_v23  ;;  %v260_v60 = vld [vmem:[%s1587_s1 + $0x720] sm:$0xff]  ;;  %v277_v61 = vld [vmem:[%s1587_s1 + $0x7a8] sm:$0xff]  ;;  %v227_v62 = vld [vmem:[%s1587_s1 + $0x618] sm:$0xff] }
  0x6d   :  { %611 = vmatpush.msrb.mxu2 %v269_v24  ;;  %630 = vmatpush.msrb.mxu3 %v286_v25  ;;  %v244_v63 = vld [vmem:[%s1587_s1 + $0x6a0] sm:$0xff]  ;;  %v259_v0 = vld [vmem:[%s1587_s1 + $0x718] sm:$0xff]  ;;  %v226_v2 = vld [vmem:[%s1587_s1 + $0x610] sm:$0xff] }
  0x6e   :  { %572 = vmatpush.msrb.mxu0 %v236_v26  ;;  %591 = vmatpush.msrb.mxu1 %v253_v27  ;;  %v276_v1 = vld [vmem:[%s1587_s1 + $0x7a0] sm:$0xff]  ;;  %v243_v3 = vld [vmem:[%s1587_s1 + $0x698] sm:$0xff]  ;;  %v258_v4 = vld [vmem:[%s1587_s1 + $0x710] sm:$0xff]  ;;  %v739_v27 = vmov 0.0  }
  0x6f   :  { %612 = vmatpush.msrb.mxu2 %v268_v28  ;;  %631 = vmatpush.msrb.mxu3 %v285_v29  ;;  %v275_v5 = vld [vmem:[%s1587_s1 + $0x798] sm:$0xff]  ;;  %v225_v6 = vld [vmem:[%s1587_s1 + $0x608] sm:$0xff]  ;;  %v242_v7 = vld [vmem:[%s1587_s1 + $0x690] sm:$0xff]  ;;  %26 = vst.msk [vmem:[#allocation2] sm:$0x3] %vm25_vm0, %v739_v27 }
  0x70   :  { %573 = vmatpush.msrb.mxu0 %v235_v30  ;;  %592 = vmatpush.msrb.mxu1 %v252_v31  ;;  %v257_v8 = vld [vmem:[%s1587_s1 + $0x708] sm:$0xff]  ;;  %v274_v9 = vld [vmem:[%s1587_s1 + $0x790] sm:$0xff]  ;;  %v224_v10 = vld [vmem:[%s1587_s1 + $0x600] sm:$0xff] }
  0x71   :  { %613 = vmatpush.msrb.mxu2 %v267_v32  ;;  %632 = vmatpush.msrb.mxu3 %v284_v33  ;;  %v241_v11 = vld [vmem:[%s1587_s1 + $0x688] sm:$0xff]  ;;  %v256_v12 = vld [vmem:[%s1587_s1 + $0x700] sm:$0xff]  ;;  %v311_v15 = vld.sshfl [vmem:[#allocation1 + $0x30] sm:$0xff pattern:$0x73625140] }
  0x72   :  { %574 = vmatpush.msrb.mxu0 %v234_v34  ;;  %593 = vmatpush.msrb.mxu1 %v251_v35  ;;  %v273_v13 = vld [vmem:[%s1587_s1 + $0x788] sm:$0xff]  ;;  %v309_v14 = vld.sshfl [vmem:[#allocation1 + $0x20] sm:$0xff pattern:$0x73625140] }
  0x73   :  { %614 = vmatpush.msrb.mxu2 %v266_v36  ;;  %633 = vmatpush.msrb.mxu3 %v283_v37  ;;  %v240_v16 = vld [vmem:[%s1587_s1 + $0x680] sm:$0xff]  ;;  %v310_v18 = vld.sshfl [vmem:[#allocation1 + $0x28] sm:$0xff pattern:$0x73625140] }
  0x74   :  { %575 = vmatpush.msrb.mxu0 %v233_v38  ;;  %594 = vmatpush.msrb.mxu1 %v250_v39  ;;  %v272_v17 = vld [vmem:[%s1587_s1 + $0x780] sm:$0xff]  ;;  %v312_v19 = vld.sshfl [vmem:[#allocation1 + $0x38] sm:$0xff pattern:$0x73625140] }
  0x75   :  { %615 = vmatpush.msrb.mxu2 %v265_v40  ;;  %634 = vmatpush.msrb.mxu3 %v282_v41  ;;  %v662_v33 = vld [vmem:[%s1589_s3] sm:$0xff] }
  0x76   :  { %576 = vmatpush.msrb.mxu0 %v232_v42  ;;  %595 = vmatpush.msrb.mxu1 %v249_v43 }
  0x77   :  { %616 = vmatpush.msrb.mxu2 %v264_v44  ;;  %635 = vmatpush.msrb.mxu3 %v281_v45 }
  0x78   :  { %577 = vmatpush.msrb.mxu0 %v231_v46  ;;  %596 = vmatpush.msrb.mxu1 %v248_v47 }
  0x79   :  { %617 = vmatpush.msrb.mxu2 %v263_v48  ;;  %636 = vmatpush.msrb.mxu3 %v280_v49 }
  0x7a   :  { %578 = vmatpush.msrb.mxu0 %v230_v50  ;;  %597 = vmatpush.msrb.mxu1 %v247_v51  ;;  %v27_v51 = vld [vmem:[#allocation2] sm:$0x3] }
  0x7b   :  { %618 = vmatpush.msrb.mxu2 %v262_v52  ;;  %637 = vmatpush.msrb.mxu3 %v279_v53 }
  0x7c   :  { %579 = vmatpush.msrb.mxu0 %v229_v54  ;;  %598 = vmatpush.msrb.mxu1 %v246_v55  ;;  %v711_v55 = vld [vmem:[%s1588_s2] ss:$0 sm:$0xff] }
  0x7d   :  { %619 = vmatpush.msrb.mxu2 %v261_v56  ;;  %638 = vmatpush.msrb.mxu3 %v278_v57 }
  0x7e   :  { %580 = vmatpush.msrb.mxu0 %v228_v58  ;;  %599 = vmatpush.msrb.mxu1 %v245_v59  ;;  %v712_v59 = vld [vmem:[%s1590_s4] ss:$0 sm:$0xff] }
  0x7f   :  { %620 = vmatpush.msrb.mxu2 %v260_v60  ;;  %639 = vmatpush.msrb.mxu3 %v277_v61 }
  0x80   :  { %581 = vmatpush.msrb.mxu0 %v227_v62  ;;  %600 = vmatpush.msrb.mxu1 %v244_v63 }
  0x81   :  { %621 = vmatpush.msrb.mxu2 %v259_v0  ;;  %640 = vmatpush.msrb.mxu3 %v276_v1 }
  0x82   :  { %582 = vmatpush.msrb.mxu0 %v226_v2  ;;  %601 = vmatpush.msrb.mxu1 %v243_v3 }
  0x83   :  { %622 = vmatpush.msrb.mxu2 %v258_v4  ;;  %641 = vmatpush.msrb.mxu3 %v275_v5 }
  0x84   :  { %583 = vmatpush.msrb.mxu0 %v225_v6  ;;  %602 = vmatpush.msrb.mxu1 %v242_v7 }
  0x85   :  { %623 = vmatpush.msrb.mxu2 %v257_v8  ;;  %642 = vmatpush.msrb.mxu3 %v274_v9 }
  0x86   :  { %584 = vmatpush.msrb.mxu0 %v224_v10  ;;  %603 = vmatpush.msrb.mxu1 %v241_v11 }
  0x87   :  { %624 = vmatpush.msrb.mxu2 %v256_v12  ;;  %643 = vmatpush.msrb.mxu3 %v273_v13 }
  0x88   :  { %585 = vmatmul.f32.vlgmr.msrb.gmra.mxu0 %v309_v14  ;;  %625 = vmatmul.f32.vlgmr.msrb.gmra.mxu2 %v311_v15 }
  0x89   :  { %604 = vmatpush.msrb.mxu1 %v240_v16  ;;  %644 = vmatpush.msrb.mxu3 %v272_v17 }
  0x8a   :  { %605 = vmatmul.f32.vlgmr.msrb.gmra.mxu1 %v310_v18  ;;  %645 = vmatmul.f32.vlgmr.msrb.gmra.mxu3 %v312_v19 }
  0x8b   :  { %686 = vmatpush.msra.mxu0 %v662_v33 }
  0xbf   :  { %v346_v21 = vpop.f32.mrf.mxu0 }
  0xc2   :  { %v366_v20 = vpop.f32.mrf.mxu1 }
  0xc3   :  { %v367_v22 = vadd.f32 %v366_v20, %v346_v21  ;;  %v386_v23 = vpop.f32.mrf.mxu2 }
  0xc5   :  { %v387_v24 = vadd.f32 %v386_v23, %v367_v22 }
  0xc6   :  { %v406_v25 = vpop.f32.mrf.mxu3 }
  0xc7   :  { %v407_v26 = vadd.f32 %v406_v25, %v387_v24 }
  0xc9   :  { %v426_v28 = vpop.f32.mrf.mxu0 }
  0xca   :  { %v427_v29 = vadd.f32 %v426_v28, %v407_v26 }
  0xcc   :  { %v446_v30 = vpop.f32.mrf.mxu1 }
  0xcd   :  { %v447_v31 = vadd.f32 %v446_v30, %v427_v29  ;;  %v466_v32 = vpop.f32.mrf.mxu2 }
  0xcf   :  { %v467_v34 = vadd.f32 %v466_v32, %v447_v31 }
  0xd0   :  { %v486_v35 = vpop.f32.mrf.mxu3 }
  0xd1   :  { %v487_v37 = vadd.f32 %v486_v35, %v467_v34 }
  0xe3   :  { %v506_v36 = vpop.f32.mrf.mxu0 }
  0xe4   :  { %v507_v38 = vadd.f32 %v506_v36, %v487_v37 }
  0xe6   :  { %v526_v39 = vpop.f32.mrf.mxu1 }
  0xe7   :  { %v527_v41 = vadd.f32 %v526_v39, %v507_v38 }
  0xe9   :  { %v546_v40 = vpop.f32.mrf.mxu2 }
  0xea   :  { %v547_v42 = vadd.f32 %v546_v40, %v527_v41 }
  0xec   :  { %v566_v43 = vpop.f32.mrf.mxu3 }
  0xed   :  { %v567_v44 = vadd.f32 %v566_v43, %v547_v42 }
 0x105   :  { %v586_v45 = vpop.f32.mrf.mxu0 }
 0x106   :  { %v587_v46 = vadd.f32 %v586_v45, %v567_v44 }
 0x107   :  { %v606_v47 = vpop.f32.mrf.mxu1 }
 0x108   :  { %v607_v48 = vadd.f32 %v606_v47, %v587_v46 }
 0x10b   :  { %v626_v49 = vpop.f32.mrf.mxu2 }
 0x10c   :  { %v627_v50 = vadd.f32 %v626_v49, %v607_v48 }
 0x10d   :  { %v646_v52 = vpop.f32.mrf.mxu3 }
 0x10e   :  { %v647_v53 = vadd.f32 %v646_v52, %v627_v50 }
 0x110   :  { %v649_v54 = vadd.f32 %v647_v53, %v27_v51 }
 0x112   :  { %651 = vst.msk [vmem:[#allocation2] sm:$0x3] %vm25_vm0, %v649_v54 }
 0x119   :  { %v655_v56 = vld [vmem:[#allocation2] sm:$0x3] }
 0x11a   :  { %v660_v57 = vadd.f32 %v711_v55, %v655_v56 }
 0x11c   :  { %v661_v58 = vmax.f32 %v660_v57, 0.0 }
 0x11e   :  { %708 = vmatmul.msk.f32.vlgmr.msra.gmra.mxu0 %vm667_vm1, %v661_v58 }
 0x19b   :  { %v688_v60 = vpop.f32.mrf.mxu0 }
 0x19c   :  { %v689_v61 = vadd.f32 %v712_v59, %v688_v60 }
 0x19e   :  { %691 = vst [vmem:[#allocation3] sm:$0x3] %v689_v61 }
 0x19f   :  { %702 = dma.vmem_to_hbm [thread:$0]  %s698_s7, 32, %s700_s10, [#allocation4]  }
 0x1a0   :  { %737 = dma.done.wait [#allocation4], 32  }
 0x1a1   :  { %738 = vsyncadd [#allocation4], 4294967264 }
 0x1a2   :  { %707 = vsyncpa [#allocation4], 1 }

</bundles_post_ra>
